<compile_context>
chip_gen: v7x
topology: tpu7x:2x2x1
jax: 0.10.0
libtpu: 0.0.40
codegen_flags: <defaults>
</compile_context>

<pallas_src>
import math
import functools

import jax
import jax.numpy as jnp
from jax.experimental import pallas as pl
from jax.experimental.pallas import tpu as pltpu


# ----------------------------------------------------------------------------
# Pallas kernel: the whole T-step recurrence, one grid iteration per step.
# ----------------------------------------------------------------------------
def _gru_seq_kernel(a_ref, b_ref, w_ref, z2_ref, h0_ref, x_ref,
                    pred_ref, hstate_ref, *, hidden_dim, output_dim):
    f32 = jnp.float32
    bf16 = jnp.bfloat16
    D = hidden_dim
    t = pl.program_id(0)

    # Initialize the VMEM-resident H state (output block with constant
    # index_map persists across the whole time grid -> accumulator pattern).
    @pl.when(t == 0)
    def _():
        hstate_ref[...] = h0_ref[...]

    H = hstate_ref[...]                      # (D, O) f32, carried across steps
    x = x_ref[0]                             # (I, F) f32, this time step only

    # Fused MXU matmuls (bf16 operands, f32 accumulation):
    #   res_a = [W_r; W_h; W_z1; 0-pad] @ x  -> (Ra, F)
    #   res_b = [U_r; U_h; U_z1; 0-pad] @ H  -> (Rb, O)
    res_a = jnp.dot(a_ref[...], x.astype(bf16), preferred_element_type=f32)
    res_b = jnp.dot(b_ref[...], H.astype(bf16), preferred_element_type=f32)

    # z gate (scalar).  The 1-row projections W_z1@x / U_z1@H rode along with
    # the fused matmuls; the remaining contractions with W_z2 / U_z2 are a VPU
    # multiply + XLU cross-lane sum -> no extra MXU pushes.
    z_lhs = jnp.sum(res_a[2 * D:2 * D + 1, :] * z2_ref[0:1, :],
                    axis=1, keepdims=True)
    z_rhs = jnp.sum(res_b[2 * D:2 * D + 1, :] * z2_ref[1:2, :],
                    axis=1, keepdims=True)
    z_t = jax.nn.sigmoid(z_lhs + z_rhs)                       # (1, 1)

    # r gate and candidate state; all gate math stays f32 (v5e VPU/EUP).
    r_t = jax.nn.sigmoid(res_a[0:D, :] + res_b[0:D, :])       # (D, O)
    h_tilde = jnp.tanh(res_a[D:2 * D, :] + r_t * res_b[D:2 * D, :])

    # Convex state update (scalar z_t broadcasts over (D, O)).
    H_new = z_t * H + (1.0 - z_t) * h_tilde                   # (D, O) f32
    hstate_ref[...] = H_new

    # prediction_t = sigmoid(W @ H_new)
    pred_ref[0] = jax.nn.sigmoid(
        jnp.dot(w_ref[...], H_new.astype(bf16), preferred_element_type=f32))


# ----------------------------------------------------------------------------
# Parameter packing (done once, outside the hot path).
# ----------------------------------------------------------------------------
def _pad_rows(a, mult):
    pad = (-a.shape[0]) % mult
    if pad:
        a = jnp.concatenate([a, jnp.zeros((pad,) + a.shape[1:], a.dtype)], axis=0)
    return a


def pack_gru_params(params, matmul_dtype=jnp.bfloat16):
    """Packs 9 weight tensors into 4 arrays (few DMAs, fused matmuls).

    pack_a = [W_r; W_h; W_z1; zero-pad]  (>=2D+1 rows, padded to mult of 16)
    pack_b = [U_r; U_h; U_z1; zero-pad]
    W      = prediction weight (used only on H_new; not in the fused matmul)
    z2     = [W_z2.T; U_z2.T]  (f32, used on the VPU)
    """
    W_z1, U_z1, W_z2, U_z2, W_r, U_r, W_h, U_h, W = params
    pack_a = _pad_rows(jnp.concatenate([W_r, W_h, W_z1], axis=0), 16).astype(matmul_dtype)
    pack_b = _pad_rows(jnp.concatenate([U_r, U_h, U_z1], axis=0), 16).astype(matmul_dtype)
    w_out = W.astype(matmul_dtype)
    z2 = jnp.concatenate([W_z2.T, U_z2.T], axis=0).astype(jnp.float32)
    return pack_a, pack_b, w_out, z2


def _const_spec(shape):
    # Whole array as one VMEM block, resident across the time grid.
    return pl.BlockSpec(shape, lambda t: (0,) * len(shape))


# ----------------------------------------------------------------------------
# Sequence forward: one pallas_call for T recurrent steps.
# ----------------------------------------------------------------------------
@jax.jit
def gru_forward_seq(xs, packed_params, H0):
    """Runs the GRU cell over xs: (T, input_dim, feature_dim).

    Returns (predictions (T, O, O), final H (D, O))."""
    pack_a, pack_b, w_out, z2 = packed_params
    T, input_dim, feature_dim = xs.shape
    hidden_dim, output_dim = H0.shape

    # The module's math (r_t * (U_h @ H), scalar z broadcast) requires
    # feature_dim == output_dim -- make that explicit.
    assert feature_dim == output_dim, "GRU math requires feature_dim == output_dim"
    assert pack_a.shape[1] == input_dim and pack_a.shape[0] >= 2 * hidden_dim + 1
    assert pack_b.shape[1] == hidden_dim and pack_b.shape[0] >= 2 * hidden_dim + 1
    assert w_out.shape == (output_dim, hidden_dim)
    assert z2.shape == (2, feature_dim)

    kernel = functools.partial(_gru_seq_kernel,
                               hidden_dim=hidden_dim, output_dim=output_dim)

    grid_spec = pltpu.PrefetchScalarGridSpec(
        num_scalar_prefetch=0,
        grid=(T,),
        in_specs=[
            _const_spec(pack_a.shape),      # weights: resident across all steps
            _const_spec(pack_b.shape),
            _const_spec(w_out.shape),
            _const_spec(z2.shape),
            _const_spec(H0.shape),          # initial state, loaded once
            pl.BlockSpec((1, input_dim, feature_dim), lambda t: (t, 0, 0)),  # streamed x
        ],
        out_specs=(
            pl.BlockSpec((1, output_dim, output_dim), lambda t: (t, 0, 0)),
            _const_spec((hidden_dim, output_dim)),   # resident H state, one writeback
        ),
    )

    out_shape = (
        jax.ShapeDtypeStruct((T, output_dim, output_dim), jnp.float32),
        jax.ShapeDtypeStruct((hidden_dim, output_dim), jnp.float32),
    )

    # Advisory cost estimate for the whole sequence.
    flops = T * (2 * (pack_a.shape[0] * input_dim * feature_dim
                      + pack_b.shape[0] * hidden_dim * output_dim
                      + output_dim * hidden_dim * output_dim)
                 + 10 * hidden_dim * output_dim)
    transcendentals = T * (2 * hidden_dim * output_dim + output_dim * output_dim + 1)
    bytes_accessed = (2 * (pack_a.size + pack_b.size + w_out.size)
                      + 4 * (z2.size + H0.size + xs.size
                             + T * output_dim * output_dim
                             + hidden_dim * output_dim))

    preds, H_new = pl.pallas_call(
        kernel,
        out_shape=out_shape,
        grid_spec=grid_spec,
        compiler_params=pltpu.CompilerParams(
            dimension_semantics=("arbitrary",)),          # recurrence: sequential
        cost_estimate=pl.CostEstimate(flops=int(flops),
                                      transcendentals=int(transcendentals),
                                      bytes_accessed=int(bytes_accessed)),
    )(pack_a, pack_b, w_out, z2, H0, xs)
    return preds, H_new


def gru_forward(x, packed_params, H):
    """Single stateful step (the original module's forward interface)."""
    preds, H_new = gru_forward_seq(x[None], packed_params, H)
    return preds[0], H_new


# ----------------------------------------------------------------------------
# Deterministic parameter initialisation (mirrors the torch module's shapes).
# ----------------------------------------------------------------------------
def _xavier_uniform(key, shape, gain):
    fan_in, fan_out = shape[1], shape[0]
    a = gain * math.sqrt(6.0 / (fan_in + fan_out))
    return jax.random.uniform(key, shape, jnp.float32, minval=-a, maxval=a)


def _kaiming_uniform(key, shape):
    fan_in = shape[1]
    bound = math.sqrt(6.0 / fan_in)
    return jax.random.uniform(key, shape, jnp.float32, minval=-bound, maxval=bound)


def init_gru_params(key, feature_dim, input_dim, hidden_dim, output_dim):
    gain_sig = 1.0            # nn.init.calculate_gain('sigmoid')
    gain_tanh = 5.0 / 3.0     # nn.init.calculate_gain('tanh')
    ks = jax.random.split(key, 10)
    W_z1 = _xavier_uniform(ks[0], (1, input_dim), gain_sig)
    U_z1 = _xavier_uniform(ks[1], (1, hidden_dim), gain_sig)
    W_z2 = _xavier_uniform(ks[2], (feature_dim, 1), gain_sig)
    U_z2 = _xavier_uniform(ks[3], (feature_dim, 1), gain_sig)
    W_r = _xavier_uniform(ks[4], (hidden_dim, input_dim), gain_sig)
    U_r = _xavier_uniform(ks[5], (hidden_dim, hidden_dim), gain_sig)
    W_h = _xavier_uniform(ks[6], (hidden_dim, input_dim), gain_tanh)
    U_h = _xavier_uniform(ks[7], (hidden_dim, hidden_dim), gain_tanh)
    W = _xavier_uniform(ks[8], (output_dim, hidden_dim), gain_sig)
    H0 = _kaiming_uniform(ks[9], (hidden_dim, output_dim))
    return (W_z1, U_z1, W_z2, U_z2, W_r, U_r, W_h, U_h, W), H0


# ----------------------------------------------------------------------------
# Pure-JAX f32 reference (literal module math, stepped over the sequence).
# ----------------------------------------------------------------------------
def gru_reference_seq(xs, params, H):
    W_z1, U_z1, W_z2, U_z2, W_r, U_r, W_h, U_h, W = params
    preds = []
    for t in range(xs.shape[0]):
        x = xs[t]
        z_t = jax.nn.sigmoid(W_z1 @ x @ W_z2 + U_z1 @ H @ U_z2)
        r_t = jax.nn.sigmoid(W_r @ x + U_r @ H)
        h_tilde = jnp.tanh(W_h @ x + r_t * (U_h @ H))
        H = z_t * H + (1.0 - z_t) * h_tilde
        preds.append(jax.nn.sigmoid(W @ H))
    return jnp.stack(preds), H


if __name__ == "__main__":
    # Small shapes consistent with the module's math (feature_dim == output_dim).
    feature_dim = 8
    input_dim = 16
    hidden_dim = 32
    output_dim = 8
    T = 8                      # sequence length amortized inside the kernel

    key = jax.random.PRNGKey(0)
    pkey, xkey = jax.random.split(key)
    params, H0 = init_gru_params(pkey, feature_dim, input_dim, hidden_dim, output_dim)
    xs = jax.random.normal(xkey, (T, input_dim, feature_dim), jnp.float32)

    # f32 reference (computed first; the kernel call does not donate buffers).
    preds_ref, H_ref = gru_reference_seq(xs, params, H0)

    packed = pack_gru_params(params)

    # Full-sequence kernel call.
    preds, H_fin = gru_forward_seq(xs, packed, H0)
    jax.block_until_ready((preds, H_fin))

    assert preds.shape == (T, output_dim, output_dim)
    assert H_fin.shape == (hidden_dim, output_dim)
    # bf16 matmul operands -> relaxed tolerance vs the f32 reference.
    assert jnp.allclose(preds, preds_ref, atol=3e-2, rtol=3e-2)
    assert jnp.allclose(H_fin, H_ref, atol=3e-2, rtol=3e-2)

    # Single-step interface (the original module's forward) still works.
    pred0, H1 = gru_forward(xs[0], packed, H0)
    jax.block_until_ready((pred0, H1))
    assert jnp.allclose(pred0, preds_ref[0], atol=3e-2, rtol=3e-2)

    print("KERNEL_OK")
</pallas_src>

<mosaic_0001>
module attributes {stable_mosaic.version = 11 : i64} {
  func.func @_gru_seq_kernel(%arg0: i32, %arg1: memref<80x16xbf16, #tpu.memory_space<vmem>>, %arg2: memref<80x32xbf16, #tpu.memory_space<vmem>>, %arg3: memref<8x32xbf16, #tpu.memory_space<vmem>>, %arg4: memref<2x8xf32, #tpu.memory_space<vmem>>, %arg5: memref<32x8xf32, #tpu.memory_space<vmem>>, %arg6: memref<1x16x8xf32, #tpu.memory_space<vmem>>, %arg7: memref<1x8x8xf32, #tpu.memory_space<vmem>>, %arg8: memref<32x8xf32, #tpu.memory_space<vmem>>) attributes {dimension_semantics = [#tpu.dimension_semantics<arbitrary>], iteration_bounds = array<i64: 8>, scalar_prefetch = 0 : i64, scratch_operands = 0 : i64, tpu.core_type = #tpu.core_type<tc>, window_params = [{pipeline_mode = #tpu.pipeline_mode<synchronous>, transform_indices = @transform_0, window_bounds = array<i64: 80, 16>}, {pipeline_mode = #tpu.pipeline_mode<synchronous>, transform_indices = @transform_1, window_bounds = array<i64: 80, 32>}, {pipeline_mode = #tpu.pipeline_mode<synchronous>, transform_indices = @transform_2, window_bounds = array<i64: 8, 32>}, {pipeline_mode = #tpu.pipeline_mode<synchronous>, transform_indices = @transform_3, window_bounds = array<i64: 2, 8>}, {pipeline_mode = #tpu.pipeline_mode<synchronous>, transform_indices = @transform_4, window_bounds = array<i64: 32, 8>}, {transform_indices = @transform_5, window_bounds = array<i64: 1, 16, 8>}, {transform_indices = @transform_6, window_bounds = array<i64: 1, 8, 8>}, {pipeline_mode = #tpu.pipeline_mode<synchronous>, transform_indices = @transform_7, window_bounds = array<i64: 32, 8>}]} {
    %c0_i32 = arith.constant 0 : i32
    %0 = arith.cmpi eq, %arg0, %c0_i32 : i32
    %1 = arith.extui %0 : i1 to i32
    %c0_i32_0 = arith.constant 0 : i32
    %2 = arith.cmpi ne, %1, %c0_i32_0 : i32
    scf.if %2 {
      %c0_27 = arith.constant 0 : index
      %c0_28 = arith.constant 0 : index
      %60 = vector.load %arg5[%c0_27, %c0_28] : memref<32x8xf32, #tpu.memory_space<vmem>>, vector<32x8xf32>
      %c0_29 = arith.constant 0 : index
      %c0_30 = arith.constant 0 : index
      %61 = vector.load %arg8[%c0_29, %c0_30] : memref<32x8xf32, #tpu.memory_space<vmem>>, vector<32x8xf32>
      tpu.vector_store %arg8[%c0_29, %c0_30], %60 {strides = array<i32>} : memref<32x8xf32, #tpu.memory_space<vmem>>, vector<32x8xf32>,
    } else {
    }
    %c0 = arith.constant 0 : index
    %c0_1 = arith.constant 0 : index
    %3 = vector.load %arg8[%c0, %c0_1] : memref<32x8xf32, #tpu.memory_space<vmem>>, vector<32x8xf32>
    %c0_2 = arith.constant 0 : index
    %c0_3 = arith.constant 0 : index
    %c0_4 = arith.constant 0 : index
    %4 = vector.load %arg6[%c0_2, %c0_3, %c0_4] : memref<1x16x8xf32, #tpu.memory_space<vmem>>, vector<1x16x8xf32>
    %5 = vector.shape_cast %4 : vector<1x16x8xf32> to vector<16x8xf32>
    %c0_5 = arith.constant 0 : index
    %c0_6 = arith.constant 0 : index
    %6 = vector.load %arg1[%c0_5, %c0_6] : memref<80x16xbf16, #tpu.memory_space<vmem>>, vector<80x16xbf16>
    %7 = arith.truncf %5 : vector<16x8xf32> to vector<16x8xbf16>
    %cst = arith.constant dense<0.000000e+00> : vector<80x8xf32>
    %8 = tpu.matmul %6, %7, %cst {dimension_numbers = #tpu.dot_dimension_numbers<[1], [0], [0], [1], [0, 0, 1, 1], [], []>} : vector<80x16xbf16>, vector<16x8xbf16>, vector<80x8xf32> -> vector<80x8xf32>
    %c0_7 = arith.constant 0 : index
    %c0_8 = arith.constant 0 : index
    %9 = vector.load %arg2[%c0_7, %c0_8] : memref<80x32xbf16, #tpu.memory_space<vmem>>, vector<80x32xbf16>
    %10 = arith.truncf %3 : vector<32x8xf32> to vector<32x8xbf16>
    %cst_9 = arith.constant dense<0.000000e+00> : vector<80x8xf32>
    %11 = tpu.matmul %9, %10, %cst_9 {dimension_numbers = #tpu.dot_dimension_numbers<[1], [0], [0], [1], [0, 0, 1, 1], [], []>} : vector<80x32xbf16>, vector<32x8xbf16>, vector<80x8xf32> -> vector<80x8xf32>
    %12 = vector.extract_strided_slice %8 {offsets = [64, 0], sizes = [1, 8], strides = [1, 1]} : vector<80x8xf32> to vector<1x8xf32>
    %c0_10 = arith.constant 0 : index
    %c0_11 = arith.constant 0 : index
    %13 = vector.load %arg4[%c0_10, %c0_11] : memref<2x8xf32, #tpu.memory_space<vmem>>, vector<1x8xf32>
    %14 = arith.mulf %12, %13 : vector<1x8xf32>
    %cst_12 = arith.constant dense<0.000000e+00> : vector<1xf32>
    %15 = vector.multi_reduction <add>, %14, %cst_12 [1] : vector<1x8xf32> to vector<1xf32>
    %16 = vector.shape_cast %15 : vector<1xf32> to vector<1x1xf32>
    %17 = vector.extract_strided_slice %11 {offsets = [64, 0], sizes = [1, 8], strides = [1, 1]} : vector<80x8xf32> to vector<1x8xf32>
    %c1 = arith.constant 1 : index
    %c0_13 = arith.constant 0 : index
    %18 = vector.load %arg4[%c1, %c0_13] : memref<2x8xf32, #tpu.memory_space<vmem>>, vector<1x8xf32>
    %19 = arith.mulf %17, %18 : vector<1x8xf32>
    %cst_14 = arith.constant dense<0.000000e+00> : vector<1xf32>
    %20 = vector.multi_reduction <add>, %19, %cst_14 [1] : vector<1x8xf32> to vector<1xf32>
    %21 = vector.shape_cast %20 : vector<1xf32> to vector<1x1xf32>
    %22 = arith.addf %16, %21 : vector<1x1xf32>
    %23 = arith.negf %22 : vector<1x1xf32>
    %24 = math.exp %23 : vector<1x1xf32>
    %cst_15 = arith.constant 1.000000e+00 : f32
    %25 = vector.broadcast %cst_15 : f32 to vector<1x1xf32>
    %26 = arith.addf %25, %24 : vector<1x1xf32>
    %27 = arith.divf %25, %26 : vector<1x1xf32>
    %28 = vector.extract_strided_slice %8 {offsets = [0, 0], sizes = [32, 8], strides = [1, 1]} : vector<80x8xf32> to vector<32x8xf32>
    %29 = vector.extract_strided_slice %11 {offsets = [0, 0], sizes = [32, 8], strides = [1, 1]} : vector<80x8xf32> to vector<32x8xf32>
    %30 = arith.addf %28, %29 : vector<32x8xf32>
    %31 = arith.negf %30 : vector<32x8xf32>
    %32 = math.exp %31 : vector<32x8xf32>
    %cst_16 = arith.constant 1.000000e+00 : f32
    %33 = vector.broadcast %cst_16 : f32 to vector<32x8xf32>
    %34 = arith.addf %33, %32 : vector<32x8xf32>
    %35 = arith.divf %33, %34 : vector<32x8xf32>
    %36 = vector.extract_strided_slice %8 {offsets = [32, 0], sizes = [32, 8], strides = [1, 1]} : vector<80x8xf32> to vector<32x8xf32>
    %37 = vector.extract_strided_slice %11 {offsets = [32, 0], sizes = [32, 8], strides = [1, 1]} : vector<80x8xf32> to vector<32x8xf32>
    %38 = arith.mulf %35, %37 : vector<32x8xf32>
    %39 = arith.addf %36, %38 : vector<32x8xf32>
    %40 = math.tanh %39 : vector<32x8xf32>
    %41 = vector.broadcast %27 : vector<1x1xf32> to vector<32x8xf32>
    %42 = arith.mulf %41, %3 : vector<32x8xf32>
    %cst_17 = arith.constant 1.000000e+00 : f32
    %43 = vector.broadcast %cst_17 : f32 to vector<1x1xf32>
    %44 = arith.subf %43, %27 : vector<1x1xf32>
    %45 = vector.broadcast %44 : vector<1x1xf32> to vector<32x8xf32>
    %46 = arith.mulf %45, %40 : vector<32x8xf32>
    %47 = arith.addf %42, %46 : vector<32x8xf32>
    %c0_18 = arith.constant 0 : index
    %c0_19 = arith.constant 0 : index
    %48 = vector.load %arg8[%c0_18, %c0_19] : memref<32x8xf32, #tpu.memory_space<vmem>>, vector<32x8xf32>
    tpu.vector_store %arg8[%c0_18, %c0_19], %47 {strides = array<i32>} : memref<32x8xf32, #tpu.memory_space<vmem>>, vector<32x8xf32>,
    %c0_20 = arith.constant 0 : index
    %c0_21 = arith.constant 0 : index
    %49 = vector.load %arg3[%c0_20, %c0_21] : memref<8x32xbf16, #tpu.memory_space<vmem>>, vector<8x32xbf16>
    %50 = arith.truncf %47 : vector<32x8xf32> to vector<32x8xbf16>
    %cst_22 = arith.constant dense<0.000000e+00> : vector<8x8xf32>
    %51 = tpu.matmul %49, %50, %cst_22 {dimension_numbers = #tpu.dot_dimension_numbers<[1], [0], [0], [1], [0, 0, 1, 1], [], []>} : vector<8x32xbf16>, vector<32x8xbf16>, vector<8x8xf32> -> vector<8x8xf32>
    %52 = arith.negf %51 : vector<8x8xf32>
    %53 = math.exp %52 : vector<8x8xf32>
    %cst_23 = arith.constant 1.000000e+00 : f32
    %54 = vector.broadcast %cst_23 : f32 to vector<8x8xf32>
    %55 = arith.addf %54, %53 : vector<8x8xf32>
    %56 = arith.divf %54, %55 : vector<8x8xf32>
    %c0_24 = arith.constant 0 : index
    %c0_25 = arith.constant 0 : index
    %c0_26 = arith.constant 0 : index
    %57 = vector.load %arg7[%c0_24, %c0_25, %c0_26] : memref<1x8x8xf32, #tpu.memory_space<vmem>>, vector<1x8x8xf32>
    %58 = vector.shape_cast %57 : vector<1x8x8xf32> to vector<8x8xf32>
    %59 = vector.shape_cast %56 : vector<8x8xf32> to vector<1x8x8xf32>
    tpu.vector_store %arg7[%c0_24, %c0_25, %c0_26], %59 {strides = array<i32>} : memref<1x8x8xf32, #tpu.memory_space<vmem>>, vector<1x8x8xf32>,
    return
  }
  func.func @transform_0(%arg0: i32) -> (i32, i32) {
    %c0_i32 = arith.constant 0 : i32
    %c0_i32_0 = arith.constant 0 : i32
    %c0_i32_1 = arith.constant 0 : i32
    return %c0_i32, %c0_i32_0 : i32, i32
  }
  func.func @transform_1(%arg0: i32) -> (i32, i32) {
    %c0_i32 = arith.constant 0 : i32
    %c0_i32_0 = arith.constant 0 : i32
    %c0_i32_1 = arith.constant 0 : i32
    return %c0_i32, %c0_i32_0 : i32, i32
  }
  func.func @transform_2(%arg0: i32) -> (i32, i32) {
    %c0_i32 = arith.constant 0 : i32
    %c0_i32_0 = arith.constant 0 : i32
    %c0_i32_1 = arith.constant 0 : i32
    return %c0_i32, %c0_i32_0 : i32, i32
  }
  func.func @transform_3(%arg0: i32) -> (i32, i32) {
    %c0_i32 = arith.constant 0 : i32
    %c0_i32_0 = arith.constant 0 : i32
    %c0_i32_1 = arith.constant 0 : i32
    return %c0_i32, %c0_i32_0 : i32, i32
  }
  func.func @transform_4(%arg0: i32) -> (i32, i32) {
    %c0_i32 = arith.constant 0 : i32
    %c0_i32_0 = arith.constant 0 : i32
    %c0_i32_1 = arith.constant 0 : i32
    return %c0_i32, %c0_i32_0 : i32, i32
  }
  func.func @transform_5(%arg0: i32) -> (i32, i32, i32) {
    %c0_i32 = arith.constant 0 : i32
    %c0_i32_0 = arith.constant 0 : i32
    %c0_i32_1 = arith.constant 0 : i32
    return %arg0, %c0_i32, %c0_i32_0 : i32, i32, i32
  }
  func.func @transform_6(%arg0: i32) -> (i32, i32, i32) {
    %c0_i32 = arith.constant 0 : i32
    %c0_i32_0 = arith.constant 0 : i32
    %c0_i32_1 = arith.constant 0 : i32
    return %arg0, %c0_i32, %c0_i32_0 : i32, i32, i32
  }
  func.func @transform_7(%arg0: i32) -> (i32, i32) {
    %c0_i32 = arith.constant 0 : i32
    %c0_i32_0 = arith.constant 0 : i32
    %c0_i32_1 = arith.constant 0 : i32
    return %c0_i32, %c0_i32_0 : i32, i32
  }
}

</mosaic_0001>

<bundles_post_ra>
// kernel: gru_forward_seq.1
= control target key start
LH: loop header
LB: loop body
LE: loop exit
PB: predicated region body
PF: predicated region fallthrough
CT: control target
= control target key end

     0   :  { %13 = vsyncpa [#allocation3], 0  ;;  %s1324_s0 = inlined_call_operand.vmem [shape: bf16[80,16], index: 0, kind: input, shape index: {}]   ;;  %s1325_s1 = inlined_call_operand.vmem [shape: bf16[80,32], index: 1, kind: input, shape index: {}]   ;;  %s1326_s2 = inlined_call_operand.vmem [shape: bf16[8,32], index: 2, kind: input, shape index: {}]   ;;  %s1327_s3 = inlined_call_operand.vmem [shape: f32[2,8], index: 3, kind: input, shape index: {}]   ;;  %s1328_s4 = inlined_call_operand.vmem [shape: f32[32,8], index: 4, kind: input, shape index: {}]   ;;  %s1329_s5 = inlined_call_operand.vmem [shape: f32[8,16,8], index: 5, kind: input, shape index: {}]   ;;  %s1330_s6 = inlined_call_operand.hbm [shape: f32[8,8,8], index: 6, kind: output, shape index: {0}]   ;;  %s1331_s7 = inlined_call_operand.vmem [shape: f32[32,8], index: 7, kind: output, shape index: {1}]  }
   0x1   :  { %15 = vsyncpa [#allocation3 + $0x1], 0  ;;  %s1064_s24 = smov 0   ;;  %s1066_s25 = smov 0  }
   0x2   :  { %s1068_s26 = smov 0   ;;  %s1070_s27 = smov 0  }
   0x3 LB: > { %s1085_s28 = sadd.s32 4294967295, %s1019_s27   ;;  %s760_s29 = sadd.s32 4294967294, %s1019_s27   ;;  %s1019_s27 = sphi %s1070_s27, %s1341_s27   ;;  %s1015_s26 = sphi %s1068_s26, %s1340_s26   ;;  %s1011_s25 = sphi %s1066_s25, %s1339_s25   ;;  %s1007_s24 = sphi %s1064_s24, %s1338_s24  }
   0x4   : > { %s1089_s30 = sadd.s32 1, %s1019_s27   ;;  %s159_s8 = sadd.s32 1, %s1015_s26 }
   0x5   : > { %s156_s9 = ssub.s32 %s1019_s27, %s1089_s30  ;;  %p169_p0 = scmp.ne.s32.totalorder %s1015_s26, %s1011_s25 }
   0x6   : > { %p157_p1 = scmp.eq.s32.totalorder %s156_s9, 0  ;;  %p170_p2 = scmp.eq.s32.totalorder %s1085_s28, 7 }
   0x7   : > { %p175_p3 = scmp.ne.s32.totalorder %s1011_s25, %s1007_s24  ;;  %p176_p4 = scmp.eq.s32.totalorder %s760_s29, 7 }
   0x8   : > { %s1100_s10 = scalar_select %p157_p1, %s1015_s26, %s159_s8  }
   0x9   : > { %p1102_p5 = por %p170_p2, %p169_p0  ;;  %p1106_p6 = por %p176_p4, %p175_p3 }
   0xa   : > { %p763_p7 = scmp.ge.s32.totalorder %s1019_s27, 1  ;;  %p238_p8 = scmp.lt.s32.totalorder %s1019_s27, 9 }
   0xc   : > { %p239_p9 = pnand %p763_p7, %p238_p8 }
   0xd   : > { %s1332_s13 = sand.u32 (!%p239_p9), 1, %s1011_s25   ;;  %p270_p10 = scmp.lt.s32.totalorder (!%p239_p9), %s1085_s28, 7 }
   0xe   : > { %242 = sbr.rel (%p239_p9) target bundleno = 726 (0x2d6), region = 44  ;;  %s1116_s14 = sshll.u32 (!%p239_p9), %s1332_s13, 3 }
   0xf   : > { %p767_p11 = scmp.ne.s32.totalorder (!%p239_p9), %s1085_s28, 0 }
  0x15   : > { %s271_s15 = scalar_select %p270_p10, %s1085_s28, 7 }
  0x16   : > { %279 = sbr.rel (%p767_p11) target bundleno = 29 (0x1d), region = 48  ;;  %v280_v0 = vld [vmem:[%s1328_s4] sm:$0xff] (!%p767_p11)  ;;  %vm284_vm0 = vcmask (!%p767_p11), 64512   ;;  %v281_v1 = vld [vmem:[%s1328_s4 + $0x8] sm:$0xff] (!%p767_p11)  ;;  %v282_v2 = vld [vmem:[%s1328_s4 + $0x10] sm:$0xff] (!%p767_p11) }
  0x17   : > { %s799_s16 = sshll.u32 %s271_s15, 4  ;;  %285 = vst.msk [vmem:[%s1331_s7] sm:$0xff] (!%p767_p11), %vm284_vm0, %v280_v0  ;;  %286 = vst.msk [vmem:[%s1331_s7 + $0x8] sm:$0xff] (!%p767_p11), %vm284_vm0, %v281_v1  ;;  %v283_v3 = vld [vmem:[%s1328_s4 + $0x18] sm:$0xff] (!%p767_p11) }
  0x18   : > { %s274_s19 = scalar_lea.vmem %s1329_s5, %s799_s16  ;;  %287 = vst.msk [vmem:[%s1331_s7 + $0x10] sm:$0xff] (!%p767_p11), %vm284_vm0, %v282_v2  ;;  %288 = vst.msk [vmem:[%s1331_s7 + $0x18] sm:$0xff] (!%p767_p11), %vm284_vm0, %v283_v3 }
  0x1d PF: > { %v293_v4 = vld [vmem:[%s274_s19] sm:$0xff]  ;;  %v294_v5 = vld [vmem:[%s274_s19 + $0x8] sm:$0xff]  ;;  %v1021_v7 = vmov 0.0   ;;  %vm1022_vm1 = vmmov 0   ;;  %vm331_vm2 = vcmask 130048   ;;  %vm456_vm3 = vcmask 261120  }
  0x1e   : > { %v1151_v6 = vld [vmem:[%s1331_s7] sm:$0xff]  ;;  %816 = vmatprep.subr.bf16.mxu1 %v1021_v7  ;;  %838 = vmatprep.subr.bf16.mxu0 %v1021_v7  ;;  %v305_v8 = vpack.c.bf16 %v294_v5, %v293_v4  ;;  %v1158_v9 = vld [vmem:[%s1331_s7 + $0x8] sm:$0xff]  ;;  %v919_v18 = vld [vmem:[%s1324_s0 + $0x10] sm:$0xff]   ;;  %vm546_vm4 = vcmask 57344   ;;  %vm623_vm5 = vcmask 64512   ;;  %s796_s20 = sshll.u32 %s1085_s28, 7 }
  0x1f   : > { %v429_v10 = vpack.c.bf16 %v1158_v9, %v1151_v6  ;;  %818 = vmatprep.mubr.msk.bf16.mxu1 %vm1022_vm1, %v1021_v7  ;;  %v915_v11 = vld [vmem:[%s1324_s0] sm:$0xff]   ;;  %v1170_v12 = vld [vmem:[%s1331_s7 + $0x10] sm:$0xff]  ;;  %v1175_v13 = vld [vmem:[%s1331_s7 + $0x18] sm:$0xff]  ;;  %842 = vmatprep.mubr.msk.bf16.mxu0 %vm1022_vm1, %v1021_v7  ;;  %s1335_s19 = scalar_lea.vmem [#allocation2], %s1116_s14  ;;  %s1277_s18 = scalar_lea.hbm %s1330_s6, %s796_s20 }
  0x20   : > { %817 = vmatpush3.bf16.msra.mxu1 %v305_v8  ;;  %v430_v14 = vpack.c.bf16 %v1175_v13, %v1170_v12  ;;  %v916_v15 = vld [vmem:[%s1325_s1] sm:$0xff]   ;;  %v917_v16 = vld [vmem:[%s1324_s0 + $0x8] sm:$0xff]   ;;  %v920_v19 = vld [vmem:[%s1325_s1 + $0x10] sm:$0xff]   ;;  %s695_s15 = sshll.u32 %s1335_s19, 4  ;;  %s1336_s21 = smov %s1335_s19  ;;  %s1279_s15 = int_to_ptr.vmem [resolvable:$true] %s695_s15 }
  0x21   : > { %839 = vmatpush3.bf16.msra.mxu0 %v429_v10  ;;  %862 = vmatprep.subr.bf16.mxu1 %v1021_v7  ;;  %v918_v17 = vld [vmem:[%s1325_s1 + $0x8] sm:$0xff]   ;;  %v921_v20 = vld [vmem:[%s1324_s0 + $0x18] sm:$0xff]   ;;  %v923_v22 = vld [vmem:[%s1324_s0 + $0x20] sm:$0xff]   ;;  %s1337_s22 = sand.u32 1, %s1011_s25   ;;  %s957_s29 = scalar_lea.vmem %s1279_s15, 128 }
  0x22   : > { %840 = vmatprep.subr.bf16.mxu0 %v1021_v7  ;;  %v922_v21 = vld [vmem:[%s1325_s1 + $0x18] sm:$0xff]   ;;  %v924_v23 = vld [vmem:[%s1325_s1 + $0x20] sm:$0xff]   ;;  %s682_s23 = scalar_lea.sflag [#allocation3], %s1337_s22  ;;  %p958_p12 = scmp.ne.s32.totalorder %s1279_s15, %s957_s29 }
  0x23   : > { %819 = vmatmul.mubr.msk.bf16.vlgmr.msra.gmra.mrb[0].mxu1 %vm331_vm2, %v915_v11  ;;  %v544_v5 = vld [vmem:[%s1327_s3] sm:$0x1]  ;;  %s1023_s28 = smov [#allocation2]  }
  0x24   : > { %822 = vmatprep.mubr.msk.bf16.mxu1 %vm1022_vm1, %v1021_v7  ;;  %p959_p13 = pnand %p958_p12, %p1102_p5  ;;  %s961_s8 = sshll.u32 %s1023_s28, 4  ;;  %s962_s8 = int_to_ptr.vmem [resolvable:$false] %s961_s8 }
  0x25   : > { %841 = vmatpush3.bf16.msra.mxu0 %v430_v14  ;;  %s963_s9 = scalar_lea.vmem %s962_s8, 256  ;;  %p964_p1 = scmp.lt.s32.totalorder %s1279_s15, %s962_s8 }
  0x26   : > { %p960_p0 = pneg %p959_p13  ;;  %p965_p2 = scmp.lt.s32.totalorder %s963_s9, %s957_s29 }
  0x28   : > { %843 = vmatmul.mubr.msk.bf16.vlgmr.msra.gmra.mrb[0].mxu0 %vm456_vm3, %v916_v15  ;;  %p966_p3 = por %p965_p2, %p964_p1 }
  0x29   : > { %846 = vmatprep.mubr.msk.bf16.mxu0 %vm1022_vm1, %v1021_v7 }
  0x2a   : > { %p967_p4 = pnand %p966_p3, %p960_p0 }
  0x2b   : > { %823 = vmatmul.mubr.msk.bf16.gmra.mrb[4].mxu1 %vm331_vm2, %v917_v16 }
  0x2c   : > { %826 = vmatprep.mubr.msk.bf16.mxu1 %vm1022_vm1, %v1021_v7 }
  0x30   : > { %847 = vmatmul.mubr.msk.bf16.gmra.mrb[4].mxu0 %vm456_vm3, %v918_v17 }
  0x31   : > { %850 = vmatprep.mubr.msk.bf16.mxu0 %vm1022_vm1, %v1021_v7 }
  0x33   : > { %827 = vmatmul.mubr.msk.bf16.gmra.mrb[8].mxu1 %vm331_vm2, %v919_v18 }
  0x34   : > { %830 = vmatprep.mubr.msk.bf16.mxu1 %vm1022_vm1, %v1021_v7 }
  0x38   : > { %851 = vmatmul.mubr.msk.bf16.gmra.mrb[8].mxu0 %vm456_vm3, %v920_v19 }
  0x39   : > { %854 = vmatprep.mubr.msk.bf16.mxu0 %vm1022_vm1, %v1021_v7 }
  0x3b   : > { %831 = vmatmul.mubr.msk.bf16.gmra.mrb[12].mxu1 %vm331_vm2, %v921_v20 }
  0x3c   : > { %834 = vmatprep.mubr.msk.bf16.mxu1 %vm1022_vm1, %v1021_v7 }
  0x40   : > { %855 = vmatmul.mubr.msk.bf16.gmra.mrb[12].mxu0 %vm456_vm3, %v922_v21 }
  0x41   : > { %858 = vmatprep.mubr.msk.bf16.mxu0 %vm1022_vm1, %v1021_v7 }
  0x43   : > { %835 = vmatmul.mubr.msk.bf16.gmra.mrb[16].mxu1 %vm331_vm2, %v923_v22 }
  0x44   : > { %866 = vmatprep.mubr.msk.bf16.mxu1 %vm1022_vm1, %v1021_v7 }
  0x48   : > { %859 = vmatmul.mubr.msk.bf16.gmra.mrb[16].mxu0 %vm456_vm3, %v924_v23  ;;  %v550_v23 = vld [vmem:[%s1327_s3 + $0x1] sm:$0x1] }
  0xf6   : > { %v381_v24 = vpop.f32.mrb[0].mxu1 }
  0xf7   : > { %v820_v25 = vpop.f32.mrb[1].mxu1 }
  0xf8   : > { %v384_v26 = vpop.f32.mrb[2].mxu1 }
  0xf9   : > { %v821_v27 = vpop.f32.mrb[3].mxu1 }
  0xfb   : > { %v506_v28 = vpop.f32.mrb[0].mxu0 }
  0xfc   : > { %v562_v29 = vadd.f32 %v506_v28, %v381_v24  ;;  %v844_v30 = vpop.f32.mrb[1].mxu0 }
  0xfd   : > { %v509_v31 = vpop.f32.mrb[2].mxu0 }
  0xfe   : > { %v789_v32 = vmul.f32 -1.442695, %v562_v29  ;;  %v563_v33 = vadd.f32 %v509_v31, %v384_v26  ;;  %v845_v34 = vpop.f32.mrb[3].mxu0  ;;  %v389_v35 = vpop.f32.mrb[4].mxu1 }
  0xff   : > { %v824_v36 = vpop.f32.mrb[5].mxu1 }
 0x100   : > { %925 = vpow2.f32 %v789_v32  ;;  %v790_v37 = vmul.f32 -1.442695, %v563_v33  ;;  %v392_v38 = vpop.f32.mrb[6].mxu1 }
 0x101   : > { %v825_v39 = vpop.f32.mrb[7].mxu1 }
 0x102   : > { %927 = vpow2.f32 %v790_v37 }
 0x103   : > { %v514_v40 = vpop.f32.mrb[4].mxu0 }
 0x104   : > { %v564_v41 = vadd.f32 %v514_v40, %v389_v35  ;;  %v848_v42 = vpop.f32.mrb[5].mxu0 }
 0x105   : > { %v517_v43 = vpop.f32.mrb[6].mxu0 }
 0x106   : > { %v791_v44 = vmul.f32 -1.442695, %v564_v41  ;;  %v565_v45 = vadd.f32 %v517_v43, %v392_v38  ;;  %v849_v46 = vpop.f32.mrb[7].mxu0  ;;  %v397_v47 = vpop.f32.mrb[8].mxu1 }
 0x107   : > { %v828_v48 = vpop.f32.mrb[9].mxu1 }
 0x108   : > { %929 = vpow2.f32 %v791_v44  ;;  %v792_v49 = vmul.f32 -1.442695, %v565_v45  ;;  %v400_v50 = vpop.f32.mrb[10].mxu1  ;;  %v602_v45 = vlaneseq }
 0x109   : > { %v829_v51 = vpop.f32.mrb[11].mxu1 }
 0x10a   : > { %v926_v52 = vpop.eup %925  ;;  %931 = vpow2.f32 %v792_v49  ;;  %v603_v46 = vshrl.u32 %v602_v45, 7 }
 0x10b   : > { %v578_v53 = vadd.f32 1.0, %v926_v52  ;;  %v522_v54 = vpop.f32.mrb[8].mxu0 }
 0x10c   : > { %v928_v55 = vpop.eup %927  ;;  %v852_v56 = vpop.f32.mrb[9].mxu0 }
 0x10d   : > { %933 = vrcp.f32 %v578_v53  ;;  %v579_v57 = vadd.f32 1.0, %v928_v55  ;;  %v525_v58 = vpop.f32.mrb[10].mxu0 }
 0x10e   : > { %v853_v59 = vpop.f32.mrb[11].mxu0  ;;  %v405_v60 = vpop.f32.mrb[12].mxu1 }
 0x10f   : > { %935 = vrcp.f32 %v579_v57  ;;  %v832_v61 = vpop.f32.mrb[13].mxu1 }
 0x110   : > { %v408_v62 = vpop.f32.mrb[14].mxu1 }
 0x111   : > { %v833_v63 = vpop.f32.mrb[15].mxu1 }
 0x112   : > { %v930_v0 = vpop.eup %929 }
 0x113   : > { %v580_v1 = vadd.f32 1.0, %v930_v0  ;;  %v530_v2 = vpop.f32.mrb[12].mxu0 }
 0x114   : > { %v932_v3 = vpop.eup %931  ;;  %v856_v4 = vpop.f32.mrb[13].mxu0 }
 0x115   : > { %937 = vrcp.f32 %v580_v1  ;;  %v581_v8 = vadd.f32 1.0, %v932_v3  ;;  %v533_v10 = vpop.f32.mrb[14].mxu0 }
 0x116   : > { %v857_v11 = vpop.f32.mrb[15].mxu0  ;;  %v413_v14 = vpop.f32.mrb[16].mxu1 }
 0x117   : > { %v934_v15 = vpop.eup %933  ;;  %939 = vrcp.f32 %v581_v8  ;;  %v545_v16 = vmul.f32 %v544_v5, %v413_v14  ;;  %v836_v17 = vpop.f32.mrb[17].mxu1 }
 0x118   : > { %v590_v18 = vmul.f32 %v934_v15, %v522_v54  ;;  %v416_v19 = vpop.f32.mrb[18].mxu1 }
 0x119   : > { %v936_v20 = vpop.eup %935  ;;  %v837_v21 = vpop.f32.mrb[19].mxu1  ;;  %v547_v22 = vsel %vm546_vm4, %v545_v16, 0.0 }
 0x11a   : > { %v594_v24 = vadd.f32 %v590_v18, %v397_v47  ;;  %v591_v25 = vmul.f32 %v936_v20, %v525_v58  ;;  %548 = vadd.xlane.f32.xlu0 %v547_v22  ;;  %v604_v47 = vsub.s32 0, %v603_v46 }
 0x11b   : > { %v538_v26 = vpop.f32.mrb[16].mxu0 }
 0x11c   : > { %v595_v27 = vadd.f32 %v591_v25, %v400_v50  ;;  %v551_v28 = vmul.f32 %v550_v23, %v538_v26  ;;  %v860_v29 = vpop.f32.mrb[17].mxu0 }
 0x11d   : > { %v541_v30 = vpop.f32.mrb[18].mxu0 }
 0x11e   : > { %v861_v31 = vpop.f32.mrb[19].mxu0  ;;  %v552_v32 = vsel %vm546_vm4, %v551_v28, 0.0 }
 0x11f   : > { %v938_v33 = vpop.eup %937  ;;  %553 = vadd.xlane.f32.xlu0 %v552_v32 }
 0x120   : > { %v592_v34 = vmul.f32 %v938_v33, %v530_v2 }
 0x121   : > { %v940_v35 = vpop.eup %939 }
 0x122   : > { %v596_v36 = vadd.f32 %v592_v34, %v405_v60  ;;  %v593_v37 = vmul.f32 %v940_v35, %v533_v10 }
 0x124   : > { %v597_v38 = vadd.f32 %v593_v37, %v408_v62 }
 0x1a7   : > { %v549_v39 = vpop.xlane.xlu0 %548 }
 0x1ac   : > { %v554_v40 = vpop.xlane.xlu0 %553 }
 0x1ad   : > { %v555_v41 = vadd.f32 %v554_v40, %v549_v39 }
 0x1af   : > { %v788_v42 = vmul.f32 -1.442695, %v555_v41 }
 0x1b1   : > { %941 = vpow2.f32 %v788_v42 }
 0x1bb   : > { %v942_v43 = vpop.eup %941 }
 0x1bc   : > { %v559_v44 = vadd.f32 1.0, %v942_v43 }
 0x1be   : > { %943 = vrcp.f32 %v559_v44 }
 0x1bf   : > { %945 = vtanh.f32 %v594_v24 }
 0x1c0   : > { %947 = vtanh.f32 %v595_v27 }
 0x1c1   : > { %949 = vtanh.f32 %v596_v36 }
 0x1c2   : > { %951 = vtanh.f32 %v597_v38 }
 0x1c8   : > { %v944_v48 = vpop.eup %943 }
 0x1c9   : > { %v946_v49 = vpop.eup %945  ;;  %v605_v50 = vrot.slane %v944_v48, %v604_v47  ;;  %v610_v51 = vsub.f32 1.0, %v944_v48 }
 0x1ca   : > { %v948_v52 = vpop.eup %947 }
 0x1cb   : > { %v950_v53 = vpop.eup %949  ;;  %v614_v54 = vrot.slane %v610_v51, %v604_v47  ;;  %v606_v56 = vmul.f32 %v605_v50, %v1151_v6  ;;  %v607_v57 = vmul.f32 %v605_v50, %v1158_v9  ;;  %v608_v58 = vmul.f32 %v605_v50, %v1170_v12  ;;  %v628_v6 = vld [vmem:[%s1326_s2] sm:$0xf] }
 0x1cc   : > { %v952_v55 = vpop.eup %951  ;;  %v609_v59 = vmul.f32 %v605_v50, %v1175_v13 }
 0x1cd   : > { %v615_v60 = vmul.f32 %v946_v49, %v614_v54  ;;  %v616_v61 = vmul.f32 %v948_v52, %v614_v54  ;;  %v617_v62 = vmul.f32 %v950_v53, %v614_v54  ;;  %v618_v63 = vmul.f32 %v952_v55, %v614_v54 }
 0x1cf   : > { %v619_v0 = vadd.f32 %v615_v60, %v606_v56  ;;  %v620_v1 = vadd.f32 %v616_v61, %v607_v57  ;;  %v621_v2 = vadd.f32 %v617_v62, %v608_v58  ;;  %v622_v3 = vadd.f32 %v618_v63, %v609_v59 }
 0x1d1   : > { %v629_v4 = vpack.c.bf16 %v620_v1, %v619_v0  ;;  %v630_v5 = vpack.c.bf16 %v622_v3, %v621_v2  ;;  %624 = vst.msk [vmem:[%s1331_s7] sm:$0xff] %vm623_vm5, %v619_v0  ;;  %625 = vst.msk [vmem:[%s1331_s7 + $0x8] sm:$0xff] %vm623_vm5, %v620_v1 }
 0x1d2   : > { %626 = vst.msk [vmem:[%s1331_s7 + $0x10] sm:$0xff] %vm623_vm5, %v621_v2  ;;  %627 = vst.msk [vmem:[%s1331_s7 + $0x18] sm:$0xff] %vm623_vm5, %v622_v3 }
 0x1d3   : > { %863 = vmatpush3.bf16.msra.mxu1 %v629_v4 }
 0x1d4   : > { %864 = vmatprep.subr.bf16.mxu1 %v1021_v7 }
 0x1d7   : > { %865 = vmatpush3.bf16.msra.mxu1 %v630_v5 }
 0x1da   : > { %867 = vmatmul.mubr.msk.bf16.vlgmr.msra.gmra.mrb[20].mxu1 %vm456_vm3, %v628_v6 }
 0x2ad   : > { %v668_v9 = vpop.f32.mrb[20].mxu1 }
 0x2ae   : > { %v794_v12 = vmul.f32 -1.442695, %v668_v9  ;;  %v868_v13 = vpop.f32.mrb[21].mxu1 }
 0x2af   : > { %v671_v8 = vpop.f32.mrb[22].mxu1 }
 0x2b0   : > { %953 = vpow2.f32 %v794_v12  ;;  %v869_v10 = vpop.f32.mrb[23].mxu1 }
 0x2ba   : > { %v954_v11 = vpop.eup %953 }
 0x2bb   : > { %v677_v14 = vadd.f32 1.0, %v954_v11 }
 0x2bd   : > { %955 = vrcp.f32 %v677_v14 }
 0x2c7   : > { %v956_v7 = vpop.eup %955 }
 0x2c8   : > { %680 = vst.msk [vmem:[%s1336_s21] sm:$0xff] %vm623_vm5, %v956_v7 }
 0x2c9   : > { %970 = shalt.err (!%p967_p4)
}
 0x2ca   : > { %s971_s14 = scalar_lea.hbm %s1277_s18, 128  ;;  %s975_s19 = scalar_lea.hbm %s1330_s6, 1024 }
 0x2cb   : > { %p972_p7 = scmp.ne.s32.totalorder %s1277_s18, %s971_s14  ;;  %p976_p10 = scmp.lt.u32.totalorder %s1277_s18, %s1330_s6 }
 0x2cc   : > { %p977_p11 = scmp.lt.u32.totalorder %s975_s19, %s971_s14  ;;  %p979_p13 = scmp.lt.u32.totalorder %s971_s14, %s1277_s18 }
 0x2cd   : > { %p973_p8 = pnand %p972_p7, %p1102_p5 }
 0x2ce   : > { %p978_p12 = por %p977_p11, %p976_p10 }
 0x2cf   : > { %p974_p9 = pneg %p973_p8 }
 0x2d0   : > { %p980_p0 = por %p979_p13, %p978_p12 }
 0x2d2   : > { %p981_p1 = pnand %p980_p0, %p974_p9 }
 0x2d4   : > { %984 = shalt.err (!%p981_p1)
}
 0x2d5   : > { %874 = dma.vmem_to_hbm [thread:$0]  (%p1102_p5), %s1279_s15, 128, %s1277_s18, %s682_s23  }
 0x2d6 PF: > { %p880_p2 = scmp.ge.s32.totalorder %s1019_s27, 2  ;;  %s713_s21 = sand.u32 1, %s1007_s24  }
 0x2d7   : > { %s714_s22 = scalar_lea.sflag [#allocation3], %s713_s21 }
 0x2d8   : > { %p877_p3 = pnand %p880_p2, %p1106_p6 }
 0x2da   : > { %1002 = dma.done.wait (!%p877_p3), %s714_s22, 128  }
 0x2db   : > { %1004 = vsyncadd (!%p877_p3), %s714_s22, 4294967168  ;;  %p18_p4 = scmp.ge.s32.totalorder %s1089_s30, 10   ;;  %s1338_s24 = smov %s1011_s25 }
 0x2dc   : > { %s1339_s25 = smov %s1015_s26  ;;  %s1340_s26 = smov %s1100_s10 }
 0x2dd   : > { %s1341_s27 = smov %s1089_s30  ;;  %20 = sbr.rel (!%p18_p4) target bundleno = 3 (0x3), region = 91 }
 0x2e4   :  { %719 = vsyncpa [#allocation3], 1 }
 0x2e5   :  { %721 = vsyncpa [#allocation3 + $0x1], 1 }

</bundles_post_ra>
